<compile_context>
chip_gen: v6e
topology: v6e:2x2x1
jax: 0.10.0
libtpu: 0.0.40
codegen_flags: <defaults>
</compile_context>

<pallas_src>
import functools

import jax
import jax.numpy as jnp
from jax.experimental import pallas as pl
from jax.experimental.pallas import tpu as pltpu


def _round_up(n, m):
    return -(-n // m) * m


def _fused_mlp_kernel(*refs, num_layers):
    """refs = (x_ref, w1_ref, b1_ref, ..., wL_ref, bL_ref, o_ref)."""
    x_ref = refs[0]
    o_ref = refs[-1]
    param_refs = refs[1:-1]

    h = x_ref[...]  # f32 activations
    for li in range(num_layers):
        w_ref = param_refs[2 * li]      # bf16 weights (in, out)
        b_ref = param_refs[2 * li + 1]  # f32 bias (1, out)
        # MXU matmul: bf16 x bf16 -> f32 accumulate; bias add + tanh in f32.
        h = jnp.dot(h.astype(jnp.bfloat16), w_ref[...],
                    preferred_element_type=jnp.float32)
        h = h + b_ref[...]
        if li < num_layers - 1:
            h = jnp.tanh(h)  # EUP; hidden activation only (no output act)
    o_ref[...] = h.astype(o_ref.dtype)


def fused_mlp(x, params, *, max_batch_tile=1024):
    """Run the full MLP forward in a single Pallas kernel.

    x: (B, In) float32.
    params: list of (w, b2) with w: (In_l, Out_l) bf16, b2: (1, Out_l) f32.
    The last layer is expected to be lane-padded (Out_L a multiple of 128).
    Returns (B, Out_L) float32 (caller slices off any lane padding).
    """
    B, in_dim = x.shape
    out_dim = params[-1][0].shape[1]
    num_layers = len(params)

    # ----- batch-tile selection ---------------------------------------------
    if B <= max_batch_tile:
        if B >= 64:
            # Guarantee >= 2 grid programs so the "parallel" axis shards the
            # batch across both TensorCores on v7x (harmless on 1-TC chips).
            tb = _round_up(pl.cdiv(B, 2), 8)
        else:
            tb = B  # tiny batch: one full-extent tile, launch-overhead bound
    else:
        tb = max_batch_tile  # multiple of 8 (f32 sublane)
        if B % tb:
            # Prefer a multiple-of-8 tile that divides B (avoid a ragged,
            # fully-masked tail step), but never shrink below half the target.
            for cand in range(max_batch_tile, max_batch_tile // 2 - 1, -8):
                if B % cand == 0:
                    tb = cand
                    break
    grid = (pl.cdiv(B, tb),)

    # x / out are tiled over the batch grid axis; all weights & biases are
    # full-extent blocks pinned to (0, 0) so they stay resident in VMEM.
    in_specs = [pl.BlockSpec((tb, in_dim), lambda i: (i, 0))]
    flat_params = []
    for (w, b2) in params:
        in_specs.append(pl.BlockSpec(w.shape, lambda i: (0, 0)))
        in_specs.append(pl.BlockSpec(b2.shape, lambda i: (0, 0)))
        flat_params.extend([w, b2])
    out_specs = pl.BlockSpec((tb, out_dim), lambda i: (i, 0))

    kernel = functools.partial(_fused_mlp_kernel, num_layers=num_layers)
    return pl.pallas_call(
        kernel,
        out_shape=jax.ShapeDtypeStruct((B, out_dim), x.dtype),
        grid=grid,
        in_specs=in_specs,
        out_specs=out_specs,
        compiler_params=pltpu.CompilerParams(
            dimension_semantics=("parallel",),
            vmem_limit_bytes=32 * 1024 * 1024),
    )(x, *flat_params)


class MLP:
    """JAX/Pallas port of the PyTorch MLP module (tanh hidden activations,
    no output activation, output_squeeze=False)."""

    LANE = 128  # lane width: final layer padded to a multiple of this

    def __init__(self, layers, key):
        self.out_dim = layers[-1]
        self.params = []
        for i, out_dim in enumerate(layers[1:]):
            in_dim = layers[i]
            key, wkey = jax.random.split(key)
            # PyTorch nn.Linear default weight init: U(-1/sqrt(in), 1/sqrt(in));
            # biases are zeroed by the module's nn.init.zeros_.
            bound = float(in_dim) ** -0.5
            w = jax.random.uniform(
                wkey, (in_dim, out_dim), dtype=jnp.float32,
                minval=-bound, maxval=bound)
            w = w.astype(jnp.bfloat16)  # bf16 weights for the MXU / DMA
            b2 = jnp.zeros((1, out_dim), dtype=jnp.float32)  # pre-shaped (1, Out)
            self.params.append((w, b2))

        # Lane-dense output: pad the LAST layer to a multiple of 128 output
        # columns ONCE at init (zero columns + zero bias), so the kernel's
        # output stores are unmasked 128-lane vst's. Padding is sliced off
        # host-side in __call__.
        self._kernel_params = list(self.params)
        self._out_pad = _round_up(self.out_dim, self.LANE)
        if self._out_pad != self.out_dim:
            pad = self._out_pad - self.out_dim
            w_l, b_l = self._kernel_params[-1]
            self._kernel_params[-1] = (
                jnp.pad(w_l, ((0, 0), (0, pad))),
                jnp.pad(b_l, ((0, 0), (0, pad))),
            )

    def __call__(self, x):
        # Entire forward pass fused into one pallas_call.
        out = fused_mlp(x, self._kernel_params)
        return out[:, :self.out_dim]  # drop lane padding


if __name__ == "__main__":
    key = jax.random.PRNGKey(0)
    key, xkey, mkey = jax.random.split(key, 3)

    # layers = [16, 32, 32, 4]: input dim 16, two hidden layers of 32, out 4
    layer_sizes = [16, 32, 32, 4]
    batch = 8
    x = jax.random.normal(xkey, (batch, layer_sizes[0]), dtype=jnp.float32)

    mlp = MLP(layer_sizes, mkey)
    out = mlp(x)
    out = jax.block_until_ready(out)

    # Reference check in plain JAX with identical math (bf16 MXU inputs,
    # f32 accumulation, f32 bias/tanh).
    ref = x
    for li, (w, b2) in enumerate(mlp.params):
        ref = jnp.dot(ref.astype(jnp.bfloat16), w,
                      preferred_element_type=jnp.float32) + b2
        if li < len(mlp.params) - 1:
            ref = jnp.tanh(ref)

    assert out.shape == (batch, layer_sizes[-1])
    assert jnp.allclose(out, ref, atol=1e-4, rtol=1e-4), (
        float(jnp.max(jnp.abs(out - ref))))

    print("KERNEL_OK")
</pallas_src>

<mosaic_0001>
module attributes {stable_mosaic.version = 11 : i64} {
  func.func @_fused_mlp_kernel(%arg0: i32, %arg1: memref<8x16xf32, #tpu.memory_space<vmem>>, %arg2: memref<16x32xbf16, #tpu.memory_space<vmem>>, %arg3: memref<1x32xf32, #tpu.memory_space<vmem>>, %arg4: memref<32x32xbf16, #tpu.memory_space<vmem>>, %arg5: memref<1x32xf32, #tpu.memory_space<vmem>>, %arg6: memref<32x128xbf16, #tpu.memory_space<vmem>>, %arg7: memref<1x128xf32, #tpu.memory_space<vmem>>, %arg8: memref<8x128xf32, #tpu.memory_space<vmem>>) attributes {dimension_semantics = [#tpu.dimension_semantics<parallel>], iteration_bounds = array<i64: 1>, scalar_prefetch = 0 : i64, scratch_operands = 0 : i64, tpu.core_type = #tpu.core_type<tc>, window_params = [{transform_indices = @transform_0, window_bounds = array<i64: 8, 16>}, {pipeline_mode = #tpu.pipeline_mode<synchronous>, transform_indices = @transform_1, window_bounds = array<i64: 16, 32>}, {pipeline_mode = #tpu.pipeline_mode<synchronous>, transform_indices = @transform_2, window_bounds = array<i64: 1, 32>}, {pipeline_mode = #tpu.pipeline_mode<synchronous>, transform_indices = @transform_3, window_bounds = array<i64: 32, 32>}, {pipeline_mode = #tpu.pipeline_mode<synchronous>, transform_indices = @transform_4, window_bounds = array<i64: 1, 32>}, {pipeline_mode = #tpu.pipeline_mode<synchronous>, transform_indices = @transform_5, window_bounds = array<i64: 32, 128>}, {pipeline_mode = #tpu.pipeline_mode<synchronous>, transform_indices = @transform_6, window_bounds = array<i64: 1, 128>}, {transform_indices = @transform_7, window_bounds = array<i64: 8, 128>}]} {
    %c0 = arith.constant 0 : index
    %c0_0 = arith.constant 0 : index
    %0 = vector.load %arg1[%c0, %c0_0] : memref<8x16xf32, #tpu.memory_space<vmem>>, vector<8x16xf32>
    %1 = arith.truncf %0 : vector<8x16xf32> to vector<8x16xbf16>
    %c0_1 = arith.constant 0 : index
    %c0_2 = arith.constant 0 : index
    %2 = vector.load %arg2[%c0_1, %c0_2] : memref<16x32xbf16, #tpu.memory_space<vmem>>, vector<16x32xbf16>
    %cst = arith.constant dense<0.000000e+00> : vector<8x32xf32>
    %3 = tpu.matmul %1, %2, %cst {dimension_numbers = #tpu.dot_dimension_numbers<[1], [0], [0], [1], [0, 0, 1, 1], [], []>} : vector<8x16xbf16>, vector<16x32xbf16>, vector<8x32xf32> -> vector<8x32xf32>
    %c0_3 = arith.constant 0 : index
    %c0_4 = arith.constant 0 : index
    %4 = vector.load %arg3[%c0_3, %c0_4] : memref<1x32xf32, #tpu.memory_space<vmem>>, vector<1x32xf32>
    %5 = vector.broadcast %4 : vector<1x32xf32> to vector<8x32xf32>
    %6 = arith.addf %3, %5 : vector<8x32xf32>
    %7 = math.tanh %6 : vector<8x32xf32>
    %8 = arith.truncf %7 : vector<8x32xf32> to vector<8x32xbf16>
    %c0_5 = arith.constant 0 : index
    %c0_6 = arith.constant 0 : index
    %9 = vector.load %arg4[%c0_5, %c0_6] : memref<32x32xbf16, #tpu.memory_space<vmem>>, vector<32x32xbf16>
    %cst_7 = arith.constant dense<0.000000e+00> : vector<8x32xf32>
    %10 = tpu.matmul %8, %9, %cst_7 {dimension_numbers = #tpu.dot_dimension_numbers<[1], [0], [0], [1], [0, 0, 1, 1], [], []>} : vector<8x32xbf16>, vector<32x32xbf16>, vector<8x32xf32> -> vector<8x32xf32>
    %c0_8 = arith.constant 0 : index
    %c0_9 = arith.constant 0 : index
    %11 = vector.load %arg5[%c0_8, %c0_9] : memref<1x32xf32, #tpu.memory_space<vmem>>, vector<1x32xf32>
    %12 = vector.broadcast %11 : vector<1x32xf32> to vector<8x32xf32>
    %13 = arith.addf %10, %12 : vector<8x32xf32>
    %14 = math.tanh %13 : vector<8x32xf32>
    %15 = arith.truncf %14 : vector<8x32xf32> to vector<8x32xbf16>
    %c0_10 = arith.constant 0 : index
    %c0_11 = arith.constant 0 : index
    %16 = vector.load %arg6[%c0_10, %c0_11] : memref<32x128xbf16, #tpu.memory_space<vmem>>, vector<32x128xbf16>
    %cst_12 = arith.constant dense<0.000000e+00> : vector<8x128xf32>
    %17 = tpu.matmul %15, %16, %cst_12 {dimension_numbers = #tpu.dot_dimension_numbers<[1], [0], [0], [1], [0, 0, 1, 1], [], []>} : vector<8x32xbf16>, vector<32x128xbf16>, vector<8x128xf32> -> vector<8x128xf32>
    %c0_13 = arith.constant 0 : index
    %c0_14 = arith.constant 0 : index
    %18 = vector.load %arg7[%c0_13, %c0_14] : memref<1x128xf32, #tpu.memory_space<vmem>>, vector<1x128xf32>
    %19 = vector.broadcast %18 : vector<1x128xf32> to vector<8x128xf32>
    %20 = arith.addf %17, %19 : vector<8x128xf32>
    %c0_15 = arith.constant 0 : index
    %c0_16 = arith.constant 0 : index
    %21 = vector.load %arg8[%c0_15, %c0_16] : memref<8x128xf32, #tpu.memory_space<vmem>>, vector<8x128xf32>
    tpu.vector_store %arg8[%c0_15, %c0_16], %20 {strides = array<i32>} : memref<8x128xf32, #tpu.memory_space<vmem>>, vector<8x128xf32>,
    return
  }
  func.func @transform_0(%arg0: i32) -> (i32, i32) {
    %c0_i32 = arith.constant 0 : i32
    %c0_i32_0 = arith.constant 0 : i32
    return %arg0, %c0_i32 : i32, i32
  }
  func.func @transform_1(%arg0: i32) -> (i32, i32) {
    %c0_i32 = arith.constant 0 : i32
    %c0_i32_0 = arith.constant 0 : i32
    %c0_i32_1 = arith.constant 0 : i32
    return %c0_i32, %c0_i32_0 : i32, i32
  }
  func.func @transform_2(%arg0: i32) -> (i32, i32) {
    %c0_i32 = arith.constant 0 : i32
    %c0_i32_0 = arith.constant 0 : i32
    %c0_i32_1 = arith.constant 0 : i32
    return %c0_i32, %c0_i32_0 : i32, i32
  }
  func.func @transform_3(%arg0: i32) -> (i32, i32) {
    %c0_i32 = arith.constant 0 : i32
    %c0_i32_0 = arith.constant 0 : i32
    %c0_i32_1 = arith.constant 0 : i32
    return %c0_i32, %c0_i32_0 : i32, i32
  }
  func.func @transform_4(%arg0: i32) -> (i32, i32) {
    %c0_i32 = arith.constant 0 : i32
    %c0_i32_0 = arith.constant 0 : i32
    %c0_i32_1 = arith.constant 0 : i32
    return %c0_i32, %c0_i32_0 : i32, i32
  }
  func.func @transform_5(%arg0: i32) -> (i32, i32) {
    %c0_i32 = arith.constant 0 : i32
    %c0_i32_0 = arith.constant 0 : i32
    %c0_i32_1 = arith.constant 0 : i32
    return %c0_i32, %c0_i32_0 : i32, i32
  }
  func.func @transform_6(%arg0: i32) -> (i32, i32) {
    %c0_i32 = arith.constant 0 : i32
    %c0_i32_0 = arith.constant 0 : i32
    %c0_i32_1 = arith.constant 0 : i32
    return %c0_i32, %c0_i32_0 : i32, i32
  }
  func.func @transform_7(%arg0: i32) -> (i32, i32) {
    %c0_i32 = arith.constant 0 : i32
    %c0_i32_0 = arith.constant 0 : i32
    return %arg0, %c0_i32 : i32, i32
  }
}

</mosaic_0001>

<bundles_post_ra>
// kernel: tpu_custom_call.1
= control target key start
LH: loop header
LB: loop body
LE: loop exit
PB: predicated region body
PF: predicated region fallthrough
CT: control target
= control target key end

     0   :  { %12 = vsyncpa [#allocation3], 0  ;;  %s548_s0 = inlined_call_operand.hbm [shape: f32[8,16], index: 0, kind: input, shape index: {}]   ;;  %s549_s1 = inlined_call_operand.hbm [shape: bf16[16,32], index: 1, kind: input, shape index: {}]   ;;  %s550_s2 = inlined_call_operand.vmem [shape: f32[1,32], index: 2, kind: input, shape index: {}]   ;;  %s551_s3 = inlined_call_operand.hbm [shape: bf16[32,32], index: 3, kind: input, shape index: {}]   ;;  %s552_s4 = inlined_call_operand.vmem [shape: f32[1,32], index: 4, kind: input, shape index: {}]   ;;  %s553_s5 = inlined_call_operand.hbm [shape: bf16[32,128], index: 5, kind: input, shape index: {}]   ;;  %s554_s6 = inlined_call_operand.vmem [shape: f32[1,128], index: 6, kind: input, shape index: {}]   ;;  %s555_s7 = inlined_call_operand.hbm [shape: f32[8,128], index: 7, kind: output, shape index: {}]  }
   0x1   :  { %13 = vsyncpa [#allocation6], 0 }
   0x2   :  { %14 = vsyncpa [#allocation9], 0 }
   0x3   :  { %15 = vsyncpa [#allocation4], 0  ;;  %s464_s24 = smov [#allocation5]  }
   0x4   :  { %s31_s25 = sshll.u32 %s464_s24, 4  ;;  %s32_s25 = int_to_ptr.vmem [resolvable:$true] %s31_s25 }
   0x5   :  { %s364_s26 = scalar_lea.vmem %s32_s25, 128  ;;  %p369_p1 = scmp.lt.s32.totalorder %s32_s25, %s32_s25 }
   0x6   :  { %p365_p0 = scmp.ne.s32.totalorder %s32_s25, %s364_s26  ;;  %p370_p2 = scmp.lt.s32.totalorder %s364_s26, %s364_s26 }
   0x8   :  { %p371_p3 = por %p370_p2, %p369_p1 }
   0xa   :  { %p372_p4 = pnand %p371_p3, %p365_p0 }
   0xc   :  { %375 = shalt.err (!%p372_p4)
}
   0xd   :  { %s465_s27 = smov 64   ;;  %s466_s28 = smov 4  }
   0xe   :  { %37 = dma.hbm_to_vmem [thread:$0]  %s549_s1, 128, %s32_s25, [#allocation6], %s465_s27, %s465_s27, %s466_s28  }
   0xf   :  { %s467_s8 = smov [#allocation2]   ;;  %s468_s10 = smov [#allocation7]  }
  0x10   :  { %s22_s9 = sshll.u32 %s467_s8, 4  ;;  %s45_s11 = sshll.u32 %s468_s10, 4  ;;  %s23_s9 = int_to_ptr.vmem [resolvable:$true] %s22_s9  ;;  %s46_s11 = int_to_ptr.vmem [resolvable:$true] %s45_s11 }
  0x11   :  { %s384_s12 = scalar_lea.vmem %s23_s9, 128  ;;  %p389_p6 = scmp.lt.s32.totalorder %s23_s9, %s23_s9 }
  0x12   :  { %p385_p5 = scmp.ne.s32.totalorder %s23_s9, %s384_s12  ;;  %p390_p7 = scmp.lt.s32.totalorder %s384_s12, %s384_s12 }
  0x14   :  { %p391_p8 = por %p390_p7, %p389_p6 }
  0x16   :  { %p392_p9 = pnand %p391_p8, %p385_p5 }
  0x18   :  { %395 = shalt.err (!%p392_p9)
}
  0x19   :  { %25 = dma.hbm_to_vmem [thread:$0]  %s548_s0, 128, %s23_s9, [#allocation3]  }
  0x1a   :  { %s404_s15 = scalar_lea.vmem %s46_s11, 256  ;;  %p409_p11 = scmp.lt.s32.totalorder %s46_s11, %s46_s11 }
  0x1b   :  { %p405_p10 = scmp.ne.s32.totalorder %s46_s11, %s404_s15  ;;  %p410_p12 = scmp.lt.s32.totalorder %s404_s15, %s404_s15 }
  0x1d   :  { %p411_p13 = por %p410_p12, %p409_p11 }
  0x1f   :  { %p412_p0 = pnand %p411_p13, %p405_p10 }
  0x21   :  { %415 = shalt.err (!%p412_p0)
}
  0x22   :  { %51 = dma.hbm_to_vmem [thread:$0]  %s551_s3, 256, %s46_s11, [#allocation6], %s465_s27, %s465_s27, %s466_s28  }
  0x23   :  { %s469_s17 = smov [#allocation8]  }
  0x24   :  { %s59_s18 = sshll.u32 %s469_s17, 4  ;;  %s60_s18 = int_to_ptr.vmem [resolvable:$true] %s59_s18 }
  0x25   :  { %s424_s19 = scalar_lea.vmem %s60_s18, 256  ;;  %p429_p2 = scmp.lt.s32.totalorder %s60_s18, %s60_s18 }
  0x26   :  { %p425_p1 = scmp.ne.s32.totalorder %s60_s18, %s424_s19  ;;  %p430_p3 = scmp.lt.s32.totalorder %s424_s19, %s424_s19 }
  0x28   :  { %p431_p4 = por %p430_p3, %p429_p2 }
  0x2a   :  { %p432_p5 = pnand %p431_p4, %p425_p1 }
  0x2c   :  { %435 = shalt.err (!%p432_p5)
}
  0x2d   :  { %65 = dma.hbm_to_vmem [thread:$0]  %s553_s5, 256, %s60_s18, [#allocation9], %s465_s27, %s465_s27, %s466_s28  }
  0x2e   :  { %456 = dma.done.wait [#allocation3], 128  }
  0x2f   :  { %457 = vsyncadd [#allocation3], 4294967168 }
  0x30   :  { %458 = dma.done.wait [#allocation6], 384  }
  0x31   :  { %459 = vsyncadd [#allocation6], 4294966912 }
  0x32   :  { %460 = dma.done.wait [#allocation9], 256  }
  0x33   :  { %461 = vsyncadd [#allocation9], 4294967040  ;;  %v470_v0 = vmov 0.0   ;;  %vm471_vm0 = vmmov 0   ;;  %v347_v1 = vld [vmem:[#allocation5] sm:$0xff]   ;;  %v81_v2 = vld [vmem:[#allocation2] sm:$0xff] }
  0x34   :  { %316 = vmatprep.subr.bf16.mxu0 %v470_v0  ;;  %318 = vmatprep.mubr.msk.bf16.mxu0 %vm471_vm0, %v470_v0  ;;  %vm98_vm1 = vcmask 130048   ;;  %v82_v3 = vpack.c.bf16 %v81_v2, %v81_v2  ;;  %v348_v4 = vld [vmem:[#allocation7 + $0x8] sm:$0xff]   ;;  %v349_v5 = vld [vmem:[#allocation7] sm:$0xff]   ;;  %v297_v6 = vld [vmem:[%s550_s2] ss:$0 sm:$0xff]  ;;  %vm167_vm2 = vcmask 261120  }
  0x35   :  { %322 = vmatprep.subr.bf16.mxu1 %v470_v0  ;;  %326 = vmatprep.mubr.msk.bf16.mxu1 %vm471_vm0, %v470_v0  ;;  %v350_v14 = vld [vmem:[#allocation8 + $0x8] sm:$0xff]   ;;  %v351_v15 = vld [vmem:[#allocation8] sm:$0xff]   ;;  %s472_s24 = smov [#allocation10]  }
  0x36   :  { %317 = vmatpush3.bf16.msra.mxu0 %v347_v1  ;;  %323 = vmatpush3.bf16.msra.mxu1 %v348_v4  ;;  %v300_v16 = vld [vmem:[%s552_s4] ss:$0 sm:$0xff]  ;;  %s286_s25 = sshll.u32 %s472_s24, 4  ;;  %s287_s25 = int_to_ptr.vmem [resolvable:$true] %s286_s25 }
  0x37   :  { %330 = vmatprep.subr.bf16.mxu0 %v470_v0  ;;  %324 = vmatprep.subr.bf16.mxu1 %v470_v0  ;;  %v304_v24 = vld [vmem:[%s554_s6] ss:$0 sm:$0xff]  ;;  %s436_s4 = scalar_lea.vmem %s287_s25, 128  ;;  %p441_p7 = scmp.lt.s32.totalorder %s287_s25, %s287_s25 }
  0x38   :  { %p437_p6 = scmp.ne.s32.totalorder %s287_s25, %s436_s4  ;;  %p442_p8 = scmp.lt.s32.totalorder %s436_s4, %s436_s4 }
  0x39   :  { %319 = vmatmul.mubr.msk.bf16.vlgmr.msra.gmra.mxu0 %vm98_vm1, %v82_v3 }
  0x3a   :  { %334 = vmatprep.mubr.msk.bf16.mxu0 %vm471_vm0, %v470_v0  ;;  %325 = vmatpush3.bf16.msra.mxu1 %v349_v5  ;;  %p443_p9 = por %p442_p8, %p441_p7 }
  0x3b   :  { %331 = vmatpush3.bf16.msra.mxu0 %v350_v14 }
  0x3c   :  { %332 = vmatprep.subr.bf16.mxu0 %v470_v0  ;;  %p444_p10 = pnand %p443_p9, %p437_p6 }
  0x3f   :  { %333 = vmatpush3.bf16.msra.mxu0 %v351_v15 }
  0xf9   :  { %v136_v7 = vpop.f32.mrf.mxu0 }
  0xfa   :  { %v137_v8 = vadd.f32 %v297_v6, %v136_v7 }
  0xfb   :  { %v320_v9 = vpop.f32.mrf.mxu0 }
  0xfc   :  { %352 = vtanh.f32 %v137_v8 }
  0xfd   :  { %v139_v10 = vpop.f32.mrf.mxu0 }
  0xff   :  { %v321_v11 = vpop.f32.mrf.mxu0 }
 0x109   :  { %v353_v12 = vpop.eup %352 }
 0x10a   :  { %v143_v13 = vpack.c.bf16 %v353_v12, %v353_v12 }
 0x10c   :  { %327 = vmatmul.mubr.msk.bf16.vlgmr.msra.gmra.mxu1 %vm167_vm2, %v143_v13 }
 0x1cc   :  { %v205_v17 = vpop.f32.mrf.mxu1 }
 0x1cd   :  { %v206_v18 = vadd.f32 %v300_v16, %v205_v17 }
 0x1ce   :  { %v328_v19 = vpop.f32.mrf.mxu1 }
 0x1cf   :  { %354 = vtanh.f32 %v206_v18 }
 0x1d0   :  { %v208_v20 = vpop.f32.mrf.mxu1 }
 0x1d2   :  { %v329_v21 = vpop.f32.mrf.mxu1 }
 0x1dc   :  { %v355_v22 = vpop.eup %354 }
 0x1dd   :  { %v212_v23 = vpack.c.bf16 %v355_v22, %v355_v22 }
 0x1df   :  { %335 = vmatmul.mubr.msk.bf16.vlgmr.msra.gmra.mxu0 %vm167_vm2, %v212_v23 }
 0x29f   :  { %v273_v25 = vpop.f32.mrf.mxu0 }
 0x2a0   :  { %v274_v26 = vadd.f32 %v304_v24, %v273_v25 }
 0x2a1   :  { %v336_v27 = vpop.f32.mrf.mxu0 }
 0x2a2   :  { %279 = vst [vmem:[#allocation10] sm:$0xff] %v274_v26 }
 0x2a3   :  { %v276_v28 = vpop.f32.mrf.mxu0 }
 0x2a4   :  { %447 = shalt.err (!%p444_p10)
}
 0x2a5   :  { %289 = dma.vmem_to_hbm [thread:$0]  %s287_s25, 128, %s555_s7, [#allocation4]   ;;  %v337_v29 = vpop.f32.mrf.mxu0 }
 0x2a6   :  { %462 = dma.done.wait [#allocation4], 128  }
 0x2a7   :  { %463 = vsyncadd [#allocation4], 4294967168 }
 0x2a8   :  { %293 = vsyncpa [#allocation3], 1 }
 0x2a9   :  { %294 = vsyncpa [#allocation6], 1 }
 0x2aa   :  { %295 = vsyncpa [#allocation9], 1 }
 0x2ab   :  { %296 = vsyncpa [#allocation4], 1 }

</bundles_post_ra>
